<compile_context>
chip_gen: v7x
topology: tpu7x:2x2x1
jax: 0.10.0
libtpu: 0.0.40
codegen_flags: <defaults>
</compile_context>

<pallas_src>
import jax
import jax.numpy as jnp
import numpy as np
from jax.experimental import pallas as pl
from jax.experimental.pallas import tpu as pltpu


def _round_up(x, m):
    return ((x + m - 1) // m) * m


def _pick_tile(n_pad, target):
    """Largest power-of-two-ish tile <= target that divides n_pad (>=128)."""
    t = min(target, n_pad)
    while n_pad % t:
        t //= 2
    return t


# ------------------------------------------------------------------
# Kernel 1: h = relu( sum_t sum_k A_t[i,k] @ XW_t[k] )
#   grid = (row tiles [parallel], T [arbitrary], k tiles [arbitrary])
#   A/XW streamed in bf16, accumulator f32, ReLU on the last reduction step.
# ------------------------------------------------------------------
def agg_relu_kernel(a_ref, xw_ref, h_ref, acc_ref):
    t = pl.program_id(1)
    k = pl.program_id(2)

    @pl.when((t == 0) & (k == 0))
    def _():
        acc_ref[...] = jnp.zeros_like(acc_ref)

    acc_ref[...] += jnp.dot(a_ref[...], xw_ref[...],
                            preferred_element_type=jnp.float32)

    @pl.when((t == pl.num_programs(1) - 1) & (k == pl.num_programs(2) - 1))
    def _():
        h_ref[...] = jnp.maximum(acc_ref[...], 0.0)


def aggregate_relu(a_bf, xw_bf, tm, tk):
    """a_bf: [T, N_pad, N_pad] bf16, xw_bf: [T, N_pad, C_pad] bf16 -> h f32."""
    T, N_pad, _ = a_bf.shape
    C_pad = xw_bf.shape[-1]
    grid = (N_pad // tm, T, N_pad // tk)
    return pl.pallas_call(
        agg_relu_kernel,
        out_shape=jax.ShapeDtypeStruct((N_pad, C_pad), jnp.float32),
        grid_spec=pltpu.PrefetchScalarGridSpec(
            num_scalar_prefetch=0,
            grid=grid,
            in_specs=[
                # TODO(synk): at production N, if the A DMA is still exposed
                # after the bf16 cast add pipeline_mode=pl.Buffered(3) here,
                # raise vmem_limit_bytes on v5e, and shrink tk on v7x (64 MiB).
                pl.BlockSpec((None, tm, tk), lambda i, t, k: (t, i, k)),     # A_t tile
                pl.BlockSpec((None, tk, C_pad), lambda i, t, k: (t, k, 0)),  # XW_t tile
            ],
            out_specs=pl.BlockSpec((tm, C_pad), lambda i, t, k: (i, 0)),
            scratch_shapes=[pltpu.VMEM((tm, C_pad), jnp.float32)],
        ),
        compiler_params=pltpu.CompilerParams(
            dimension_semantics=("parallel", "arbitrary", "arbitrary")),
    )(a_bf, xw_bf)


# ------------------------------------------------------------------
# Kernel 2: SMEM-index gather + hadamard + folded linear score.
#   score = ((h[src] * h[dst]) @ w_sum) + b_sum      -> lane-dense (1, L_pad)
# ------------------------------------------------------------------
def score_kernel(src_ref, dst_ref, h_ref, wsum_ref, bsum_ref, score_ref, had_ref):
    n_edges = had_ref.shape[0]

    def body(l, carry):
        s = src_ref[l]
        d = dst_ref[l]
        had_ref[pl.ds(l, 1), :] = h_ref[pl.ds(s, 1), :] * h_ref[pl.ds(d, 1), :]
        return carry

    jax.lax.fori_loop(0, n_edges, body, 0)

    # Folded linear: sum_{-1}(had @ W^T + b) == had @ W.sum(0) + b.sum().
    scores = jnp.einsum("oc,lc->ol", wsum_ref[...], had_ref[...],
                        preferred_element_type=jnp.float32)          # (1, L_pad)
    score_ref[...] = scores + bsum_ref[0]


def score_from_h(h_pad, src_idx, dst_idx, w_sum_pad, b_sum, num_edges):
    """h_pad: [N_pad, C_pad] f32; src/dst: [L_pad] i32; returns (num_edges,)."""
    # TODO(synk): at production N, h no longer fits a single VMEM block; switch
    # to a DMA row-gather (manual make_async_copy per index block) here.
    N_pad, C_pad = h_pad.shape
    L_pad = src_idx.shape[0]
    out = pl.pallas_call(
        score_kernel,
        out_shape=jax.ShapeDtypeStruct((1, L_pad), jnp.float32),
        grid_spec=pltpu.PrefetchScalarGridSpec(
            num_scalar_prefetch=2,                     # src/dst indices -> SMEM
            grid=(1,),
            in_specs=[
                pl.BlockSpec((N_pad, C_pad), lambda i, src, dst: (0, 0)),   # h
                pl.BlockSpec((1, C_pad), lambda i, src, dst: (0, 0)),       # w_sum
                pl.BlockSpec(memory_space=pltpu.MemorySpace.SMEM),          # b_sum
            ],
            out_specs=pl.BlockSpec((1, L_pad), lambda i, src, dst: (0, 0)),
            scratch_shapes=[pltpu.VMEM((L_pad, C_pad), jnp.float32)],
        ),
        compiler_params=pltpu.CompilerParams(
            dimension_semantics=("arbitrary",)),
    )(src_idx, dst_idx, h_pad, w_sum_pad, b_sum)
    return out[0, :num_edges]


# ------------------------------------------------------------------
# JAX glue: EvolveGCNH weight evolution (TopK pooling + one GRU step)
# and dense gcn_norm adjacency construction.
# ------------------------------------------------------------------
def topk_pool(x, p, k):
    # TopKPooling: score = tanh(x.p / ||p||); keep top-k rows scaled by score.
    score = jnp.tanh((x @ p) / jnp.linalg.norm(p))
    idx = jnp.argsort(-score)[:k]
    return x[idx] * score[idx][:, None]


def gru_step(x, h, w_ih, w_hh, b_ih, b_hh):
    gi = x @ w_ih.T + b_ih
    gh = h @ w_hh.T + b_hh
    i_r, i_z, i_n = jnp.split(gi, 3, axis=-1)
    h_r, h_z, h_n = jnp.split(gh, 3, axis=-1)
    r = jax.nn.sigmoid(i_r + h_r)
    z = jax.nn.sigmoid(i_z + h_z)
    n = jnp.tanh(i_n + r * h_n)
    return (1.0 - z) * n + z * h


def gcn_norm_dense(edge_index, num_nodes):
    src, dst = edge_index[0], edge_index[1]
    a = jnp.zeros((num_nodes, num_nodes), jnp.float32).at[dst, src].add(1.0)
    # add_remaining_self_loops(fill_value=1.0)
    has_loop = jnp.diag(a) > 0
    a = a + jnp.diag(jnp.where(has_loop, 0.0, 1.0))
    deg = a.sum(axis=1)
    dinv = jnp.where(deg > 0, jax.lax.rsqrt(deg), 0.0)
    return dinv[:, None] * a * dinv[None, :]


def evolve_weights_and_adj(params, x, edge_index_dict):
    """Per edge type: TopK pooling -> GRU step gives W_t; build normalized A_t."""
    C = x.shape[1]
    N = x.shape[0]
    w_list, a_list = [], []
    for et in sorted(edge_index_dict.keys()):
        p = params["conv"][et]
        x_tilde = topk_pool(x, p["topk_p"], C)                           # [C, C]
        w_evolved = gru_step(x_tilde, p["init_w"],
                             p["gru_w_ih"], p["gru_w_hh"],
                             p["gru_b_ih"], p["gru_b_hh"])               # [C, C]
        w_list.append(w_evolved)
        a_list.append(gcn_norm_dense(edge_index_dict[et], N))
    return jnp.stack(w_list), jnp.stack(a_list)


def icews_hegcn_forward(params, x, edge_index_dict, edge_label_index):
    w_all, a_all = evolve_weights_and_adj(params, x, edge_index_dict)    # [T,C,C],[T,N,N]
    T, C, _ = w_all.shape
    N = x.shape[0]
    L = edge_label_index.shape[1]

    # Lane/sublane-friendly padded sizes and generation-agnostic tiles.
    C_pad = _round_up(max(C, 128), 128)
    N_pad = _round_up(N, 128)
    L_pad = _round_up(max(L, 128), 128)
    tm = _pick_tile(N_pad, 256)
    tk = _pick_tile(N_pad, 512)

    # Hoisted X@W: one wide [N,C] @ [C, T*C] matmul, reshaped to [T, N, C].
    w_cat = jnp.transpose(w_all, (1, 0, 2)).reshape(C, T * C)
    xw = jnp.transpose((x @ w_cat).reshape(N, T, C), (1, 0, 2))          # [T,N,C] f32

    # Zero-pad, then cast the streamed operands to bf16 (f32 accumulation in-kernel).
    xw_pad = jnp.zeros((T, N_pad, C_pad), jnp.float32).at[:, :N, :C].set(xw)
    a_pad = jnp.zeros((T, N_pad, N_pad), jnp.float32).at[:, :N, :N].set(a_all)
    a_bf = a_pad.astype(jnp.bfloat16)
    xw_bf = xw_pad.astype(jnp.bfloat16)

    h_pad = aggregate_relu(a_bf, xw_bf, tm, tk)                          # [N_pad,C_pad] f32

    # Folded post-Linear + padded operands for the scoring kernel.
    w_sum = jnp.zeros((1, C_pad), jnp.float32).at[0, :C].set(params["post_w"].sum(axis=0))
    b_sum = params["post_b"].sum().reshape(1).astype(jnp.float32)
    src = jnp.zeros((L_pad,), jnp.int32).at[:L].set(edge_label_index[0])
    dst = jnp.zeros((L_pad,), jnp.int32).at[:L].set(edge_label_index[1])

    return score_from_h(h_pad, src, dst, w_sum, b_sum, L)


# Pure-JAX f32 reference (same math as the PyTorch module, no Pallas, no folding).
def reference_forward(params, x, edge_index_dict, edge_label_index):
    w_all, a_all = evolve_weights_and_adj(params, x, edge_index_dict)
    out = jnp.zeros_like(x)
    for t in range(w_all.shape[0]):
        out = out + a_all[t] @ (x @ w_all[t])
    h = jax.nn.relu(out)
    had = h[edge_label_index[0]] * h[edge_label_index[1]]
    logits = had @ params["post_w"].T + params["post_b"]
    return logits.sum(-1)


# Precision-matched reference: bf16 A/XW streams, f32 accumulation (mirrors kernel).
def matched_reference(params, x, edge_index_dict, edge_label_index):
    w_all, a_all = evolve_weights_and_adj(params, x, edge_index_dict)
    xw = jnp.einsum("nc,tcd->tnd", x, w_all)
    out = jnp.zeros_like(x)
    for t in range(w_all.shape[0]):
        out = out + jnp.dot(a_all[t].astype(jnp.bfloat16),
                            xw[t].astype(jnp.bfloat16),
                            preferred_element_type=jnp.float32)
    h = jax.nn.relu(out)
    had = h[edge_label_index[0]] * h[edge_label_index[1]]
    return had @ params["post_w"].sum(axis=0) + params["post_b"].sum()


# ------------------------------------------------------------------
# Deterministic parameter / input construction
# ------------------------------------------------------------------
def make_params(key, edge_types, C):
    bound = 1.0 / np.sqrt(C)

    def u(k, shape):
        return jax.random.uniform(k, shape, jnp.float32, -bound, bound)

    params = {"conv": {}}
    for et in edge_types:
        key, k1, k2, k3, k4, k5, k6 = jax.random.split(key, 7)
        params["conv"][et] = {
            "topk_p": u(k1, (C,)),           # TopKPooling projection
            "init_w": u(k2, (C, C)),         # EvolveGCNH initial weight (GRU h0)
            "gru_w_ih": u(k3, (3 * C, C)),
            "gru_w_hh": u(k4, (3 * C, C)),
            "gru_b_ih": u(k5, (3 * C,)),
            "gru_b_hh": u(k6, (3 * C,)),
        }
    key, kw, kb = jax.random.split(key, 3)
    params["post_w"] = u(kw, (2, C))         # torch.nn.Linear(C, 2)
    params["post_b"] = u(kb, (2,))
    return params


if __name__ == "__main__":
    N, C, L, E = 32, 16, 16, 64            # num_nodes, in_channels, label edges, edges/rel
    edge_types = tuple(("node", f"rel{i}", "node") for i in range(3))

    key = jax.random.PRNGKey(0)
    key, kx, kl = jax.random.split(key, 3)
    x = jax.random.normal(kx, (N, C), jnp.float32)

    edge_index_dict = {}
    for i, et in enumerate(edge_types):
        key, ks, kd = jax.random.split(key, 3)
        src = jax.random.randint(ks, (E,), 0, N)
        off = jax.random.randint(kd, (E,), 1, N)
        dst = (src + off) % N                # no self loops
        edge_index_dict[et] = jnp.stack([src, dst]).astype(jnp.int32)

    edge_label_index = jax.random.randint(kl, (2, L), 0, N).astype(jnp.int32)

    params = make_params(key, edge_types, C)

    forward_jit = jax.jit(icews_hegcn_forward)
    pred = forward_jit(params, x, edge_index_dict, edge_label_index)
    pred = jax.block_until_ready(pred)

    # Tight check vs a precision-matched (bf16-stream / f32-acc) reference.
    ref_match = matched_reference(params, x, edge_index_dict, edge_label_index)
    np.testing.assert_allclose(np.asarray(pred), np.asarray(ref_match),
                               rtol=2e-3, atol=2e-3)
    # Loose check vs the full-f32 module semantics (bf16 streaming widens tolerance).
    ref_f32 = reference_forward(params, x, edge_index_dict, edge_label_index)
    np.testing.assert_allclose(np.asarray(pred), np.asarray(ref_f32),
                               rtol=5e-2, atol=5e-2)
    assert pred.shape == (L,)
    print("KERNEL_OK")
</pallas_src>

<mosaic_0001>
module attributes {stable_mosaic.version = 11 : i64} {
  func.func private @main(%arg0: i32) attributes {dimension_semantics = [#tpu.dimension_semantics<core_parallel>], iteration_bounds = array<i64: 2>, tpu.core_type = #tpu.core_type<sc_scalar_subcore>, window_params = []} {
    return
  }
}

module attributes {stable_mosaic.version = 11 : i64} {
  func.func private @main(%arg0: i32) attributes {dimension_semantics = [#tpu.dimension_semantics<core_parallel>], iteration_bounds = array<i64: 2>, tpu.core_type = #tpu.core_type<sc_scalar_subcore>, window_params = []} {
    return
  }
}

module attributes {stable_mosaic.version = 11 : i64} {
  func.func @score_kernel(%arg0: i32, %arg1: memref<128xi32, #tpu.memory_space<smem>>, %arg2: memref<128xi32, #tpu.memory_space<smem>>, %arg3: memref<128x128xf32, #tpu.memory_space<vmem>>, %arg4: memref<1x128xf32, #tpu.memory_space<vmem>>, %arg5: memref<1xf32, #tpu.memory_space<smem>>, %arg6: memref<1x128xf32, #tpu.memory_space<vmem>>, %arg7: memref<128x128xf32, #tpu.memory_space<vmem>>) attributes {dimension_semantics = [#tpu.dimension_semantics<arbitrary>], iteration_bounds = array<i64: 1>, scalar_prefetch = 2 : i64, scratch_operands = 1 : i64, tpu.core_type = #tpu.core_type<tc>, window_params = [{pipeline_mode = #tpu.pipeline_mode<synchronous>, transform_indices = @transform_0, window_bounds = array<i64: 128, 128>}, {pipeline_mode = #tpu.pipeline_mode<synchronous>, transform_indices = @transform_1, window_bounds = array<i64: 1, 128>}, {transform_indices = @transform_2, window_bounds = array<i64: 1>}, {pipeline_mode = #tpu.pipeline_mode<synchronous>, transform_indices = @transform_3, window_bounds = array<i64: 1, 128>}]} {
    %c0_i32 = arith.constant 0 : i32
    %c128_i32 = arith.constant 128 : i32
    %0 = arith.addi %c0_i32, %c128_i32 : i32
    %c1_i32 = arith.constant 1 : i32
    scf.for %arg8 = %c0_i32 to %0 step %c1_i32  : i32 {
      %8 = arith.index_cast %arg8 : i32 to index
      %9 = memref.load %arg1[%8] : memref<128xi32, #tpu.memory_space<smem>>
      %10 = arith.index_cast %arg8 : i32 to index
      %11 = memref.load %arg2[%10] : memref<128xi32, #tpu.memory_space<smem>>
      %12 = arith.index_cast %9 : i32 to index
      %c0_7 = arith.constant 0 : index
      %13 = vector.load %arg3[%12, %c0_7] : memref<128x128xf32, #tpu.memory_space<vmem>>, vector<1x128xf32>
      %14 = arith.index_cast %11 : i32 to index
      %c0_8 = arith.constant 0 : index
      %15 = vector.load %arg3[%14, %c0_8] : memref<128x128xf32, #tpu.memory_space<vmem>>, vector<1x128xf32>
      %16 = arith.mulf %13, %15 : vector<1x128xf32>
      %17 = arith.index_cast %arg8 : i32 to index
      %c0_9 = arith.constant 0 : index
      %18 = vector.load %arg7[%17, %c0_9] : memref<128x128xf32, #tpu.memory_space<vmem>>, vector<1x128xf32>
      tpu.vector_store %arg7[%17, %c0_9], %16 {strides = array<i32>} : memref<128x128xf32, #tpu.memory_space<vmem>>, vector<1x128xf32>,
    }
    %c128_i32_0 = arith.constant 128 : i32
    %c0 = arith.constant 0 : index
    %c0_1 = arith.constant 0 : index
    %1 = vector.load %arg4[%c0, %c0_1] : memref<1x128xf32, #tpu.memory_space<vmem>>, vector<1x128xf32>
    %c0_2 = arith.constant 0 : index
    %c0_3 = arith.constant 0 : index
    %2 = vector.load %arg7[%c0_2, %c0_3] : memref<128x128xf32, #tpu.memory_space<vmem>>, vector<128x128xf32>
    "tpu.trace_start"() <{level = 10 : i32, message = "oc,lc->ol"}> : () -> ()
    %cst = arith.constant dense<0.000000e+00> : vector<1x128xf32>
    %3 = tpu.matmul %1, %2, %cst {dimension_numbers = #tpu.dot_dimension_numbers<[1], [1], [0], [0], [0, 0, 1, 0], [], []>} : vector<1x128xf32>, vector<128x128xf32>, vector<1x128xf32> -> vector<1x128xf32>
    "tpu.trace_stop"() : () -> ()
    %c0_4 = arith.constant 0 : index
    %4 = memref.load %arg5[%c0_4] : memref<1xf32, #tpu.memory_space<smem>>
    %5 = vector.broadcast %4 : f32 to vector<1x128xf32>
    %6 = arith.addf %3, %5 : vector<1x128xf32>
    %c0_5 = arith.constant 0 : index
    %c0_6 = arith.constant 0 : index
    %7 = vector.load %arg6[%c0_5, %c0_6] : memref<1x128xf32, #tpu.memory_space<vmem>>, vector<1x128xf32>
    tpu.vector_store %arg6[%c0_5, %c0_6], %6 {strides = array<i32>} : memref<1x128xf32, #tpu.memory_space<vmem>>, vector<1x128xf32>,
    return
  }
  func.func @transform_0(%arg0: i32, %arg1: memref<128xi32, #tpu.memory_space<smem>>, %arg2: memref<128xi32, #tpu.memory_space<smem>>) -> (i32, i32) {
    %c0_i32 = arith.constant 0 : i32
    %c0_i32_0 = arith.constant 0 : i32
    %c0_i32_1 = arith.constant 0 : i32
    return %c0_i32, %c0_i32_0 : i32, i32
  }
  func.func @transform_1(%arg0: i32, %arg1: memref<128xi32, #tpu.memory_space<smem>>, %arg2: memref<128xi32, #tpu.memory_space<smem>>) -> (i32, i32) {
    %c0_i32 = arith.constant 0 : i32
    %c0_i32_0 = arith.constant 0 : i32
    %c0_i32_1 = arith.constant 0 : i32
    return %c0_i32, %c0_i32_0 : i32, i32
  }
  func.func @transform_2(%arg0: i32, %arg1: memref<128xi32, #tpu.memory_space<smem>>, %arg2: memref<128xi32, #tpu.memory_space<smem>>) -> i32 {
    %c0_i32 = arith.constant 0 : i32
    %c0_i32_0 = arith.constant 0 : i32
    return %c0_i32 : i32
  }
  func.func @transform_3(%arg0: i32, %arg1: memref<128xi32, #tpu.memory_space<smem>>, %arg2: memref<128xi32, #tpu.memory_space<smem>>) -> (i32, i32) {
    %c0_i32 = arith.constant 0 : i32
    %c0_i32_0 = arith.constant 0 : i32
    %c0_i32_1 = arith.constant 0 : i32
    return %c0_i32, %c0_i32_0 : i32, i32
  }
}

module attributes {stable_mosaic.version = 11 : i64} {
  func.func @agg_relu_kernel(%arg0: i32, %arg1: i32, %arg2: i32, %arg3: memref<1x128x128xbf16, #tpu.memory_space<vmem>>, %arg4: memref<1x128x128xbf16, #tpu.memory_space<vmem>>, %arg5: memref<128x128xf32, #tpu.memory_space<vmem>>, %arg6: memref<128x128xf32, #tpu.memory_space<vmem>>) attributes {dimension_semantics = [#tpu.dimension_semantics<parallel>, #tpu.dimension_semantics<arbitrary>, #tpu.dimension_semantics<arbitrary>], iteration_bounds = array<i64: 1, 3, 1>, scalar_prefetch = 0 : i64, scratch_operands = 1 : i64, tpu.core_type = #tpu.core_type<tc>, window_params = [{transform_indices = @transform_0, window_bounds = array<i64: 1, 128, 128>}, {transform_indices = @transform_1, window_bounds = array<i64: 1, 128, 128>}, {transform_indices = @transform_2, window_bounds = array<i64: 128, 128>}]} {
    %c0_i32 = arith.constant 0 : i32
    %0 = arith.cmpi eq, %arg1, %c0_i32 : i32
    %c0_i32_0 = arith.constant 0 : i32
    %1 = arith.cmpi eq, %arg2, %c0_i32_0 : i32
    %2 = arith.andi %0, %1 : i1
    %3 = arith.extui %2 : i1 to i32
    %c0_i32_1 = arith.constant 0 : i32
    %4 = arith.cmpi ne, %3, %c0_i32_1 : i32
    scf.if %4 {
      %cst_13 = arith.constant 0.000000e+00 : f32
      %18 = vector.broadcast %cst_13 : f32 to vector<128x128xf32>
      %c0_14 = arith.constant 0 : index
      %c0_15 = arith.constant 0 : index
      %19 = vector.load %arg6[%c0_14, %c0_15] : memref<128x128xf32, #tpu.memory_space<vmem>>, vector<128x128xf32>
      tpu.vector_store %arg6[%c0_14, %c0_15], %18 {strides = array<i32>} : memref<128x128xf32, #tpu.memory_space<vmem>>, vector<128x128xf32>,
    } else {
    }
    %c0 = arith.constant 0 : index
    %c0_2 = arith.constant 0 : index
    %5 = vector.load %arg6[%c0, %c0_2] : memref<128x128xf32, #tpu.memory_space<vmem>>, vector<128x128xf32>
    %c0_3 = arith.constant 0 : index
    %c0_4 = arith.constant 0 : index
    %c0_5 = arith.constant 0 : index
    %6 = vector.load %arg3[%c0_3, %c0_4, %c0_5] : memref<1x128x128xbf16, #tpu.memory_space<vmem>>, vector<1x128x128xbf16>
    %7 = vector.shape_cast %6 : vector<1x128x128xbf16> to vector<128x128xbf16>
    %c0_6 = arith.constant 0 : index
    %c0_7 = arith.constant 0 : index
    %c0_8 = arith.constant 0 : index
    %8 = vector.load %arg4[%c0_6, %c0_7, %c0_8] : memref<1x128x128xbf16, #tpu.memory_space<vmem>>, vector<1x128x128xbf16>
    %9 = vector.shape_cast %8 : vector<1x128x128xbf16> to vector<128x128xbf16>
    %cst = arith.constant dense<0.000000e+00> : vector<128x128xf32>
    %10 = tpu.matmul %7, %9, %cst {dimension_numbers = #tpu.dot_dimension_numbers<[1], [0], [0], [1], [0, 0, 1, 1], [], []>} : vector<128x128xbf16>, vector<128x128xbf16>, vector<128x128xf32> -> vector<128x128xf32>
    %11 = arith.addf %5, %10 : vector<128x128xf32>
    %c0_9 = arith.constant 0 : index
    %c0_10 = arith.constant 0 : index
    %12 = vector.load %arg6[%c0_9, %c0_10] : memref<128x128xf32, #tpu.memory_space<vmem>>, vector<128x128xf32>
    tpu.vector_store %arg6[%c0_9, %c0_10], %11 {strides = array<i32>} : memref<128x128xf32, #tpu.memory_space<vmem>>, vector<128x128xf32>,
    %c2_i32 = arith.constant 2 : i32
    %13 = arith.cmpi eq, %arg1, %c2_i32 : i32
    %c0_i32_11 = arith.constant 0 : i32
    %14 = arith.cmpi eq, %arg2, %c0_i32_11 : i32
    %15 = arith.andi %13, %14 : i1
    %16 = arith.extui %15 : i1 to i32
    %c0_i32_12 = arith.constant 0 : i32
    %17 = arith.cmpi ne, %16, %c0_i32_12 : i32
    scf.if %17 {
      %c0_13 = arith.constant 0 : index
      %c0_14 = arith.constant 0 : index
      %18 = vector.load %arg6[%c0_13, %c0_14] : memref<128x128xf32, #tpu.memory_space<vmem>>, vector<128x128xf32>
      %cst_15 = arith.constant 0.000000e+00 : f32
      %19 = vector.broadcast %cst_15 : f32 to vector<128x128xf32>
      %20 = arith.maximumf %18, %19 : vector<128x128xf32>
      %c0_16 = arith.constant 0 : index
      %c0_17 = arith.constant 0 : index
      %21 = vector.load %arg5[%c0_16, %c0_17] : memref<128x128xf32, #tpu.memory_space<vmem>>, vector<128x128xf32>
      tpu.vector_store %arg5[%c0_16, %c0_17], %20 {strides = array<i32>} : memref<128x128xf32, #tpu.memory_space<vmem>>, vector<128x128xf32>,
    } else {
    }
    return
  }
  func.func @transform_0(%arg0: i32, %arg1: i32, %arg2: i32) -> (i32, i32, i32) {
    %c0_i32 = arith.constant 0 : i32
    return %arg1, %arg0, %arg2 : i32, i32, i32
  }
  func.func @transform_1(%arg0: i32, %arg1: i32, %arg2: i32) -> (i32, i32, i32) {
    %c0_i32 = arith.constant 0 : i32
    %c0_i32_0 = arith.constant 0 : i32
    return %arg1, %arg2, %c0_i32 : i32, i32, i32
  }
  func.func @transform_2(%arg0: i32, %arg1: i32, %arg2: i32) -> (i32, i32) {
    %c0_i32 = arith.constant 0 : i32
    %c0_i32_0 = arith.constant 0 : i32
    return %arg0, %c0_i32 : i32, i32
  }
}

</mosaic_0001>

<bundles_post_ra>
// kernel: icews_hegcn_forward.3
= control target key start
LH: loop header
LB: loop body
LE: loop exit
PB: predicated region body
PF: predicated region fallthrough
CT: control target
= control target key end

     0   :  { %s323_s0 = inlined_call_operand.vmem [shape: s32[128], index: 0, kind: input, shape index: {}]   ;;  %s324_s2 = inlined_call_operand.vmem [shape: f32[128,128], index: 2, kind: input, shape index: {}]   ;;  %s325_s3 = inlined_call_operand.vmem [shape: f32[1,128], index: 3, kind: input, shape index: {}]   ;;  %s326_s5 = inlined_call_operand.vmem [shape: f32[1,128], index: 5, kind: output, shape index: {}]   ;;  %s327_s1 = inlined_call_operand.vmem [shape: s32[128], index: 1, kind: input, shape index: {}]   ;;  %s328_s4 = inlined_call_operand.<no memory space> [shape: f32[1], index: 4, kind: input, shape index: {}]  }
   0x1   :  { %s10_s20 = sshll.u32 %s323_s0, 4  ;;  %s14_s23 = sshll.u32 %s327_s1, 4  ;;  %s11_s20 = int_to_ptr.vmem [resolvable:$true] %s10_s20  ;;  %s15_s23 = int_to_ptr.vmem [resolvable:$true] %s14_s23 }
   0x2   :  { %s233_s24 = scalar_lea.vmem %s11_s20, 16  ;;  %p238_p1 = scmp.lt.s32.totalorder %s11_s20, %s11_s20 }
   0x3   :  { %p234_p0 = scmp.ne.s32.totalorder %s11_s20, %s233_s24  ;;  %p239_p2 = scmp.lt.s32.totalorder %s233_s24, %s233_s24 }
   0x5   :  { %p240_p3 = por %p239_p2, %p238_p1 }
   0x7   :  { %p241_p4 = pnand %p240_p3, %p234_p0 }
   0x9   :  { %244 = shalt.err (!%p241_p4)  }
   0xa   :  { %s267_s25 = smov [#allocation4]   ;;  %s245_s26 = scalar_lea.vmem %s15_s23, 16 }
   0xb   :  { %13 = dma.vmem_to_smem %s11_s20, 16, %s267_s25, [#allocation3] }
   0xc   :  { %p246_p5 = scmp.ne.s32.totalorder %s15_s23, %s245_s26  ;;  %p250_p6 = scmp.lt.s32.totalorder %s15_s23, %s15_s23 }
   0xd   :  { %p251_p7 = scmp.lt.s32.totalorder %s245_s26, %s245_s26 }
   0xf   :  { %p252_p8 = por %p251_p7, %p250_p6 }
  0x11   :  { %p253_p9 = pnand %p252_p8, %p246_p5 }
  0x13   :  { %256 = shalt.err (!%p253_p9)  }
  0x14   :  { %s268_s0 = smov [#allocation5]   ;;  %18 = sst [smem:[#allocation6]] %s328_s4 }
  0x15   :  { %17 = dma.vmem_to_smem %s15_s23, 16, %s268_s0, [#allocation3] }
  0x16   :  { %261 = dma.done.wait [#allocation3], 32 }
  0x17   :  { %262 = vsyncadd [#allocation3], 4294967264 }
  0x18   :  { %20 = sfence }
  0x19   :  { %s263_s28 = smov 0  }
  0x1a LB: > { %s33_s29 = sld [smem:[#allocation4 + %s265_s28]]  ;;  %s40_s4 = scalar_lea.vmem [#allocation2], %s265_s28  ;;  %s265_s28 = sphi %s263_s28, %s32_s28  }
  0x1b   : > { %s34_s30 = sld [smem:[#allocation5 + %s265_s28]]  ;;  %s32_s28 = sadd.s32 1, %s265_s28  }
  0x1c   : > { %p29_p10 = scmp.ge.s32.totalorder %s32_s28, 128  }
  0x1d   :  { %v269_v5 = vmov (%p29_p10), 0.0|0.0   ;;  %vm270_vm0 = vmmov (%p29_p10), 0   ;;  %v271_v7 = vmov (%p29_p10), 0.0   ;;  %v42_v29 = vld [vmem:[%s325_s3] sm:$0x1] (%p29_p10)  ;;  %s59_s13 = sld [smem:[#allocation6]] (%p29_p10) }
  0x1e   :  { %196 = vmatprep.subr.bf16.mxu0 (%p29_p10), %v269_v5  ;;  %193 = vmatprep.mubr.msk.f32.mxu0 (%p29_p10), %vm270_vm0, %v271_v7 }
  0x1f   :  { %31 = sbr.rel (!%p29_p10) target bundleno = 26 (0x1a), region = 42 }
  0x20   : > { %s35_s8 = scalar_lea.vmem %s324_s2, %s33_s29 }
  0x21   : > { %s37_s11 = scalar_lea.vmem %s324_s2, %s34_s30  ;;  %v36_v0 = vld [vmem:[%s35_s8] sm:$0x1] }
  0x22   : > { %v38_v1 = vld [vmem:[%s37_s11] sm:$0x1] }
  0x23   : > { %v39_v2 = vmul.f32 %v38_v1, %v36_v0  ;;  %v60_v30 = vstv (%p29_p10), %s59_s13 }
  0x25   : > { %41 = vst [vmem:[%s40_s4] sm:$0x1] %v39_v2 }
  0x2c   :  { %v43_v3 = vld [vmem:[#allocation2] sm:$0xff]  ;;  %v44_v4 = vld [vmem:[#allocation2 + $0x8] sm:$0xff]  ;;  %v45_v8 = vld [vmem:[#allocation2 + $0x10] sm:$0xff] }
  0x2d   :  { %v197_v6 = vpack.c.bf16 %v44_v4, %v43_v3  ;;  %v46_v9 = vld [vmem:[#allocation2 + $0x18] sm:$0xff]  ;;  %v47_v11 = vld [vmem:[#allocation2 + $0x20] sm:$0xff]  ;;  %v48_v12 = vld [vmem:[#allocation2 + $0x28] sm:$0xff] }
  0x2e   :  { %v200_v10 = vpack.c.bf16 %v46_v9, %v45_v8  ;;  %v203_v13 = vpack.c.bf16 %v48_v12, %v47_v11  ;;  %v49_v14 = vld [vmem:[#allocation2 + $0x30] sm:$0xff]  ;;  %v50_v15 = vld [vmem:[#allocation2 + $0x38] sm:$0xff]  ;;  %v51_v17 = vld [vmem:[#allocation2 + $0x40] sm:$0xff] }
  0x2f   :  { %198 = vmatpush3.bf16.xpose.msra.mxu0 %v197_v6  ;;  %v206_v16 = vpack.c.bf16 %v50_v15, %v49_v14  ;;  %v52_v18 = vld [vmem:[#allocation2 + $0x48] sm:$0xff]  ;;  %v53_v20 = vld [vmem:[#allocation2 + $0x50] sm:$0xff]  ;;  %v54_v21 = vld [vmem:[#allocation2 + $0x58] sm:$0xff] }
  0x30   :  { %199 = vmatprep.subr.bf16.mxu0 %v269_v5  ;;  %v209_v19 = vpack.c.bf16 %v52_v18, %v51_v17  ;;  %v212_v22 = vpack.c.bf16 %v54_v21, %v53_v20  ;;  %v55_v23 = vld [vmem:[#allocation2 + $0x60] sm:$0xff]  ;;  %v56_v24 = vld [vmem:[#allocation2 + $0x68] sm:$0xff]  ;;  %v57_v26 = vld [vmem:[#allocation2 + $0x70] sm:$0xff] }
  0x31   :  { %v215_v25 = vpack.c.bf16 %v56_v24, %v55_v23  ;;  %v58_v27 = vld [vmem:[#allocation2 + $0x78] sm:$0xff] }
  0x32   :  { %v218_v28 = vpack.c.bf16 %v58_v27, %v57_v26 }
  0x37   :  { %201 = vmatpush3.bf16.xpose.msra.mxu0 %v200_v10 }
  0x38   :  { %202 = vmatprep.subr.bf16.mxu0 %v269_v5 }
  0x3f   :  { %204 = vmatpush3.bf16.xpose.msra.mxu0 %v203_v13 }
  0x40   :  { %205 = vmatprep.subr.bf16.mxu0 %v269_v5 }
  0x47   :  { %207 = vmatpush3.bf16.xpose.msra.mxu0 %v206_v16 }
  0x48   :  { %208 = vmatprep.subr.bf16.mxu0 %v269_v5 }
  0x4f   :  { %210 = vmatpush3.bf16.xpose.msra.mxu0 %v209_v19 }
  0x50   :  { %211 = vmatprep.subr.bf16.mxu0 %v269_v5 }
  0x57   :  { %213 = vmatpush3.bf16.xpose.msra.mxu0 %v212_v22 }
  0x58   :  { %214 = vmatprep.subr.bf16.mxu0 %v269_v5 }
  0x5f   :  { %216 = vmatpush3.bf16.xpose.msra.mxu0 %v215_v25 }
  0x60   :  { %217 = vmatprep.subr.bf16.mxu0 %v269_v5 }
  0x67   :  { %219 = vmatpush3.bf16.xpose.msra.mxu0 %v218_v28 }
  0x6e   :  { %194 = vmatmul.mubr.f32.vlgmr.msra.gmra.mrb[0].mxu0 %v42_v29 }
 0x141   :  { %v127_v31 = vpop.f32.mrb[0].mxu0 }
 0x142   :  { %v128_v32 = vadd.f32 %v127_v31, %v60_v30  ;;  %v195_v33 = vpop.f32.mrb[1].mxu0 }
 0x144   :  { %131 = vst [vmem:[%s326_s5] sm:$0x1] %v128_v32 }

// kernel: icews_hegcn_forward.2
= control target key start
LH: loop header
LB: loop body
LE: loop exit
PB: predicated region body
PF: predicated region fallthrough
CT: control target
= control target key end

     0   :  { %s847_s9 = smov 0   ;;  %s849_s10 = smov 0   ;;  %s956_s0 = inlined_call_operand.vmem [shape: bf16[3,128,128], index: 0, kind: input, shape index: {}]   ;;  %s957_s1 = inlined_call_operand.vmem [shape: bf16[3,128,128], index: 1, kind: input, shape index: {}]   ;;  %s958_s2 = inlined_call_operand.vmem [shape: f32[128,128], index: 2, kind: output, shape index: {}]  }
   0x1   :  { %s851_s11 = smov 0  }
   0x2 LB: > { %s27_s12 = sadd.s32 1, %s825_s10  ;;  %p671_p0 = scmp.ge.s32.totalorder %s829_s11, 1  ;;  %s829_s11 = sphi %s851_s11, %s12_s11   ;;  %s825_s10 = sphi %s849_s10, %s960_s10   ;;  %s821_s9 = sphi %s847_s9, %s959_s9  }
   0x3   : > { %p29_p1 = scmp.ge.s32.totalorder %s27_s12, 3  ;;  %p160_p2 = scmp.lt.s32.totalorder %s829_s11, 4 }
   0x5   : > { %s962_s12 = smov (%p29_p1, %s27_s12), 0  ;;  %p161_p3 = pnand %p671_p0, %p160_p2 }
   0x6   : > { %p199_p4 = scmp.lt.s32.totalorder (!%p161_p3), %s821_s9, 2  ;;  %p228_p5 = scmp.eq.s32.totalorder (!%p161_p3), %s821_s9, 0 }
   0x7   : > { %164 = sbr.rel (%p161_p3) target bundleno = 294 (0x126), region = 28 }
   0xe   : > { %s200_s13 = scalar_select %p199_p4, %s821_s9, 2 }
   0xf   : > { %233 = sbr.rel (!%p228_p5) target bundleno = 24 (0x18), region = 32  ;;  %v831_v0 = vmov (%p228_p5), 0.0  }
  0x10   : > { %s698_s14 = sshll.u32 %s200_s13, 6  ;;  %234 = vst [vmem:[#allocation2] sm:$0xff] (%p228_p5), %v831_v0  ;;  %235 = vst [vmem:[#allocation2 + $0x8] sm:$0xff] (%p228_p5), %v831_v0 }
  0x11   : > { %s873_s17 = scalar_lea.vmem %s956_s0, %s698_s14  ;;  %s878_s20 = scalar_lea.vmem %s957_s1, %s698_s14  ;;  %236 = vst [vmem:[#allocation2 + $0x10] sm:$0xff] (%p228_p5), %v831_v0  ;;  %237 = vst [vmem:[#allocation2 + $0x18] sm:$0xff] (%p228_p5), %v831_v0 }
  0x12   : > { %238 = vst [vmem:[#allocation2 + $0x20] sm:$0xff] (%p228_p5), %v831_v0  ;;  %239 = vst [vmem:[#allocation2 + $0x28] sm:$0xff] (%p228_p5), %v831_v0 }
  0x13   : > { %240 = vst [vmem:[#allocation2 + $0x30] sm:$0xff] (%p228_p5), %v831_v0  ;;  %241 = vst [vmem:[#allocation2 + $0x38] sm:$0xff] (%p228_p5), %v831_v0 }
  0x14   : > { %242 = vst [vmem:[#allocation2 + $0x40] sm:$0xff] (%p228_p5), %v831_v0  ;;  %243 = vst [vmem:[#allocation2 + $0x48] sm:$0xff] (%p228_p5), %v831_v0 }
  0x15   : > { %244 = vst [vmem:[#allocation2 + $0x50] sm:$0xff] (%p228_p5), %v831_v0  ;;  %245 = vst [vmem:[#allocation2 + $0x58] sm:$0xff] (%p228_p5), %v831_v0 }
  0x16   : > { %246 = vst [vmem:[#allocation2 + $0x60] sm:$0xff] %v831_v0  ;;  %247 = vst [vmem:[#allocation2 + $0x68] sm:$0xff] %v831_v0 }
  0x17   : > { %248 = vst [vmem:[#allocation2 + $0x70] sm:$0xff] %v831_v0  ;;  %249 = vst [vmem:[#allocation2 + $0x78] sm:$0xff] %v831_v0 }
  0x18 PF: > { %v791_v1 = vld [vmem:[%s878_s20] sm:$0xff]   ;;  %v792_v2 = vld [vmem:[%s878_s20 + $0x8] sm:$0xff]   ;;  %v793_v3 = vld [vmem:[%s878_s20 + $0x10] sm:$0xff]   ;;  %p523_p6 = scmp.eq.s32.totalorder %s821_s9, 2 }
  0x19   : > { %718 = vmatprep.subr.bf16.mxu0 %v791_v1  ;;  %750 = vmatprep.subr.bf16.mxu1 %v791_v1  ;;  %v794_v4 = vld [vmem:[%s878_s20 + $0x18] sm:$0xff]   ;;  %v799_v5 = vld [vmem:[%s873_s17] sm:$0xff]   ;;  %v796_v8 = vld [vmem:[%s878_s20 + $0x28] sm:$0xff]  }
  0x1a   : > { %719 = vmatpush3.bf16.msra.mxu0 %v791_v1  ;;  %758 = vmatpush3.bf16.msra.mxu1 %v791_v1  ;;  %v800_v6 = vld [vmem:[%s873_s17 + $0x20] sm:$0xff]   ;;  %v797_v9 = vld [vmem:[%s878_s20 + $0x30] sm:$0xff]   ;;  %v798_v10 = vld [vmem:[%s878_s20 + $0x38] sm:$0xff]  }
  0x1b   : > { %720 = vmatprep.subr.bf16.mxu0 %v792_v2  ;;  %751 = vmatprep.subr.bf16.mxu1 %v792_v2  ;;  %v795_v7 = vld [vmem:[%s878_s20 + $0x20] sm:$0xff]   ;;  %v801_v11 = vld [vmem:[%s873_s17 + $0x8] sm:$0xff]   ;;  %v803_v13 = vld [vmem:[%s873_s17 + $0x10] sm:$0xff]  }
  0x1c   : > { %734 = vmatprep.mubr.bf16.mxu0 %v799_v5  ;;  %742 = vmatprep.mubr.bf16.mxu1 %v800_v6  ;;  %v802_v12 = vld [vmem:[%s873_s17 + $0x28] sm:$0xff]   ;;  %v804_v14 = vld [vmem:[%s873_s17 + $0x30] sm:$0xff]   ;;  %v805_v15 = vld [vmem:[%s873_s17 + $0x18] sm:$0xff]  }
  0x1d   : > { %v806_v16 = vld [vmem:[%s873_s17 + $0x38] sm:$0xff]   ;;  %v252_v17 = vld [vmem:[#allocation2 + $0x10] sm:$0xff]  ;;  %v250_v19 = vld [vmem:[#allocation2] sm:$0xff] }
  0x1e   : > { %721 = vmatpush3.bf16.msra.mxu0 %v792_v2  ;;  %759 = vmatpush3.bf16.msra.mxu1 %v792_v2  ;;  %v260_v18 = vld [vmem:[#allocation2 + $0x50] sm:$0xff]  ;;  %v258_v20 = vld [vmem:[#allocation2 + $0x40] sm:$0xff]  ;;  %v253_v23 = vld [vmem:[#allocation2 + $0x18] sm:$0xff] }
  0x1f   : > { %722 = vmatprep.subr.bf16.mxu0 %v793_v3  ;;  %752 = vmatprep.subr.bf16.mxu1 %v793_v3  ;;  %v261_v24 = vld [vmem:[#allocation2 + $0x58] sm:$0xff]  ;;  %v251_v29 = vld [vmem:[#allocation2 + $0x8] sm:$0xff]  ;;  %v256_v41 = vld [vmem:[#allocation2 + $0x30] sm:$0xff] }
  0x20   : > { %v259_v30 = vld [vmem:[#allocation2 + $0x48] sm:$0xff]  ;;  %v264_v42 = vld [vmem:[#allocation2 + $0x70] sm:$0xff]  ;;  %v254_v43 = vld [vmem:[#allocation2 + $0x20] sm:$0xff] }
  0x21   : > { %v262_v44 = vld [vmem:[#allocation2 + $0x60] sm:$0xff]  ;;  %v257_v47 = vld [vmem:[#allocation2 + $0x38] sm:$0xff]  ;;  %v255_v53 = vld [vmem:[#allocation2 + $0x28] sm:$0xff] }
  0x22   : > { %723 = vmatpush3.bf16.msra.mxu0 %v793_v3  ;;  %760 = vmatpush3.bf16.msra.mxu1 %v793_v3  ;;  %v265_v48 = vld [vmem:[#allocation2 + $0x78] sm:$0xff]  ;;  %v263_v54 = vld [vmem:[#allocation2 + $0x68] sm:$0xff] }
  0x23   : > { %724 = vmatprep.subr.bf16.mxu0 %v794_v4  ;;  %753 = vmatprep.subr.bf16.mxu1 %v794_v4 }
  0x26   : > { %725 = vmatpush3.bf16.msra.mxu0 %v794_v4  ;;  %761 = vmatpush3.bf16.msra.mxu1 %v794_v4 }
  0x27   : > { %726 = vmatprep.subr.bf16.mxu0 %v795_v7  ;;  %754 = vmatprep.subr.bf16.mxu1 %v795_v7 }
  0x2a   : > { %727 = vmatpush3.bf16.msra.mxu0 %v795_v7  ;;  %762 = vmatpush3.bf16.msra.mxu1 %v795_v7 }
  0x2b   : > { %728 = vmatprep.subr.bf16.mxu0 %v796_v8  ;;  %755 = vmatprep.subr.bf16.mxu1 %v796_v8 }
  0x2e   : > { %729 = vmatpush3.bf16.msra.mxu0 %v796_v8  ;;  %763 = vmatpush3.bf16.msra.mxu1 %v796_v8 }
  0x2f   : > { %730 = vmatprep.subr.bf16.mxu0 %v797_v9  ;;  %756 = vmatprep.subr.bf16.mxu1 %v797_v9 }
  0x32   : > { %731 = vmatpush3.bf16.msra.mxu0 %v797_v9  ;;  %764 = vmatpush3.bf16.msra.mxu1 %v797_v9 }
  0x33   : > { %732 = vmatprep.subr.bf16.mxu0 %v798_v10  ;;  %757 = vmatprep.subr.bf16.mxu1 %v798_v10 }
  0x36   : > { %733 = vmatpush3.bf16.msra.mxu0 %v798_v10  ;;  %765 = vmatpush3.bf16.msra.mxu1 %v798_v10 }
  0x39   : > { %735 = vmatmul.mubr.bf16.vlgmr.msra.gmra.mrb[0].mxu0 %v801_v11  ;;  %743 = vmatmul.mubr.bf16.vlgmr.msra.gmra.mrb[0].mxu1 %v802_v12 }
  0x3a   : > { %738 = vmatprep.mubr.bf16.mxu0 %v803_v13  ;;  %746 = vmatprep.mubr.bf16.mxu1 %v804_v14 }
  0x41   : > { %739 = vmatmul.mubr.bf16.gmra.mrb[4].mxu0 %v805_v15  ;;  %747 = vmatmul.mubr.bf16.gmra.mrb[4].mxu1 %v806_v16 }
 0x10c   : > { %v736_v21 = vpop.f32.mrb[0].mxu0  ;;  %v744_v22 = vpop.f32.mrb[0].mxu1 }
 0x10d   : > { %v493_v25 = vadd.f32 %v736_v21, %v252_v17  ;;  %v501_v26 = vadd.f32 %v744_v22, %v260_v18  ;;  %v428_v27 = vpop.f32.mrb[1].mxu0  ;;  %v460_v28 = vpop.f32.mrb[1].mxu1 }
 0x10e   : > { %v491_v31 = vadd.f32 %v428_v27, %v250_v19  ;;  %v499_v32 = vadd.f32 %v460_v28, %v258_v20  ;;  %v737_v33 = vpop.f32.mrb[2].mxu0  ;;  %v745_v34 = vpop.f32.mrb[2].mxu1 }
 0x10f   : > { %509 = vst [vmem:[#allocation2 + $0x10] sm:$0xff] %v493_v25  ;;  %517 = vst [vmem:[#allocation2 + $0x50] sm:$0xff] %v501_v26  ;;  %v494_v35 = vadd.f32 %v737_v33, %v253_v23  ;;  %v502_v36 = vadd.f32 %v745_v34, %v261_v24  ;;  %v431_v37 = vpop.f32.mrb[3].mxu0  ;;  %v463_v38 = vpop.f32.mrb[3].mxu1 }
 0x110   : > { %507 = vst [vmem:[#allocation2] sm:$0xff] %v491_v31  ;;  %515 = vst [vmem:[#allocation2 + $0x40] sm:$0xff] %v499_v32  ;;  %v492_v39 = vadd.f32 %v431_v37, %v251_v29  ;;  %v500_v40 = vadd.f32 %v463_v38, %v259_v30 }
 0x111   : > { %510 = vst [vmem:[#allocation2 + $0x18] sm:$0xff] %v494_v35  ;;  %518 = vst [vmem:[#allocation2 + $0x58] sm:$0xff] %v502_v36 }
 0x112   : > { %508 = vst [vmem:[#allocation2 + $0x8] sm:$0xff] %v492_v39  ;;  %516 = vst [vmem:[#allocation2 + $0x48] sm:$0xff] %v500_v40 }
 0x114   : > { %v740_v45 = vpop.f32.mrb[4].mxu0  ;;  %v748_v46 = vpop.f32.mrb[4].mxu1  ;;  %527 = sbr.rel (!%p523_p6) target bundleno = 294 (0x126), region = 36 }
 0x115   : > { %v497_v49 = vadd.f32 %v740_v45, %v256_v41  ;;  %v505_v50 = vadd.f32 %v748_v46, %v264_v42  ;;  %v444_v51 = vpop.f32.mrb[5].mxu0  ;;  %v476_v52 = vpop.f32.mrb[5].mxu1 }
 0x116   : > { %v495_v55 = vadd.f32 %v444_v51, %v254_v43  ;;  %v503_v56 = vadd.f32 %v476_v52, %v262_v44  ;;  %v741_v57 = vpop.f32.mrb[6].mxu0  ;;  %v749_v58 = vpop.f32.mrb[6].mxu1  ;;  %v530_v3 = vld [vmem:[#allocation2 + $0x10] sm:$0xff] (%p523_p6) }
 0x117   : > { %513 = vst [vmem:[#allocation2 + $0x30] sm:$0xff] %v497_v49  ;;  %521 = vst [vmem:[#allocation2 + $0x70] sm:$0xff] %v505_v50  ;;  %v498_v59 = vadd.f32 %v741_v57, %v257_v47  ;;  %v506_v60 = vadd.f32 %v749_v58, %v265_v48  ;;  %v447_v61 = vpop.f32.mrb[7].mxu0  ;;  %v479_v62 = vpop.f32.mrb[7].mxu1  ;;  %v528_v1 = vld [vmem:[#allocation2] sm:$0xff] (%p523_p6)  ;;  %v546_v6 = vmax.f32 (%p523_p6), %v530_v3, 0.0 }
 0x118   : > { %511 = vst [vmem:[#allocation2 + $0x20] sm:$0xff] %v495_v55  ;;  %519 = vst [vmem:[#allocation2 + $0x60] sm:$0xff] %v503_v56  ;;  %v496_v63 = vadd.f32 %v447_v61, %v255_v53  ;;  %v504_v0 = vadd.f32 %v479_v62, %v263_v54  ;;  %v544_v4 = vmax.f32 (%p523_p6), %v528_v1, 0.0  ;;  %v531_v7 = vld [vmem:[#allocation2 + $0x18] sm:$0xff] (%p523_p6)  ;;  %v536_v15 = vld [vmem:[#allocation2 + $0x40] sm:$0xff] (%p523_p6) }
 0x119   : > { %514 = vst [vmem:[#allocation2 + $0x38] sm:$0xff] %v498_v59  ;;  %522 = vst [vmem:[#allocation2 + $0x78] sm:$0xff] %v506_v60  ;;  %v529_v2 = vld [vmem:[#allocation2 + $0x8] sm:$0xff] (%p523_p6)  ;;  %v547_v10 = vmax.f32 (%p523_p6), %v531_v7, 0.0  ;;  %v552_v18 = vmax.f32 (%p523_p6), %v536_v15, 0.0  ;;  %v538_v20 = vld [vmem:[#allocation2 + $0x50] sm:$0xff] (%p523_p6) }
 0x11a   : > { %512 = vst [vmem:[#allocation2 + $0x28] sm:$0xff] %v496_v63  ;;  %520 = vst [vmem:[#allocation2 + $0x68] sm:$0xff] %v504_v0  ;;  %v545_v5 = vmax.f32 (%p523_p6), %v529_v2, 0.0  ;;  %v537_v19 = vld [vmem:[#allocation2 + $0x48] sm:$0xff] (%p523_p6)  ;;  %v539_v21 = vld [vmem:[#allocation2 + $0x58] sm:$0xff] (%p523_p6)  ;;  %v554_v23 = vmax.f32 (%p523_p6), %v538_v20, 0.0 }
 0x11b   : > { %560 = vst [vmem:[%s958_s2] sm:$0xff] %v544_v4  ;;  %562 = vst [vmem:[%s958_s2 + $0x10] sm:$0xff] %v546_v6  ;;  %v553_v22 = vmax.f32 %v537_v19, 0.0  ;;  %v555_v24 = vmax.f32 %v539_v21, 0.0 }
 0x11c   : > { %561 = vst [vmem:[%s958_s2 + $0x8] sm:$0xff] %v545_v5  ;;  %563 = vst [vmem:[%s958_s2 + $0x18] sm:$0xff] %v547_v10 }
 0x11d   : > { %568 = vst [vmem:[%s958_s2 + $0x40] sm:$0xff] %v552_v18  ;;  %569 = vst [vmem:[%s958_s2 + $0x48] sm:$0xff] %v553_v22 }
 0x11e   : > { %v534_v13 = vld [vmem:[#allocation2 + $0x30] sm:$0xff]  ;;  %570 = vst [vmem:[%s958_s2 + $0x50] sm:$0xff] %v554_v23  ;;  %571 = vst [vmem:[%s958_s2 + $0x58] sm:$0xff] %v555_v24 }
 0x11f   : > { %v532_v8 = vld [vmem:[#allocation2 + $0x20] sm:$0xff]  ;;  %v550_v16 = vmax.f32 %v534_v13, 0.0  ;;  %v542_v27 = vld [vmem:[#allocation2 + $0x70] sm:$0xff] }
 0x120   : > { %v548_v11 = vmax.f32 %v532_v8, 0.0  ;;  %v535_v14 = vld [vmem:[#allocation2 + $0x38] sm:$0xff]  ;;  %v540_v25 = vld [vmem:[#allocation2 + $0x60] sm:$0xff]  ;;  %v558_v30 = vmax.f32 %v542_v27, 0.0 }
 0x121   : > { %v533_v9 = vld [vmem:[#allocation2 + $0x28] sm:$0xff]  ;;  %v551_v17 = vmax.f32 %v535_v14, 0.0  ;;  %566 = vst [vmem:[%s958_s2 + $0x30] sm:$0xff] %v550_v16  ;;  %v556_v28 = vmax.f32 %v540_v25, 0.0  ;;  %v543_v31 = vld [vmem:[#allocation2 + $0x78] sm:$0xff] }
 0x122   : > { %v549_v12 = vmax.f32 %v533_v9, 0.0  ;;  %564 = vst [vmem:[%s958_s2 + $0x20] sm:$0xff] %v548_v11  ;;  %v541_v26 = vld [vmem:[#allocation2 + $0x68] sm:$0xff]  ;;  %v559_v32 = vmax.f32 %v543_v31, 0.0  ;;  %574 = vst [vmem:[%s958_s2 + $0x70] sm:$0xff] %v558_v30 }
 0x123   : > { %567 = vst [vmem:[%s958_s2 + $0x38] sm:$0xff] %v551_v17  ;;  %v557_v29 = vmax.f32 %v541_v26, 0.0  ;;  %572 = vst [vmem:[%s958_s2 + $0x60] sm:$0xff] %v556_v28 }
 0x124   : > { %565 = vst [vmem:[%s958_s2 + $0x28] sm:$0xff] %v549_v12  ;;  %575 = vst [vmem:[%s958_s2 + $0x78] sm:$0xff] %v559_v32 }
 0x125   : > { %573 = vst [vmem:[%s958_s2 + $0x68] sm:$0xff] %v557_v29 }
 0x126 PF: > { %s12_s11 = sadd.s32 1, %s829_s11   ;;  %s959_s9 = smov %s825_s10 }
 0x127   : > { %p9_p7 = scmp.ge.s32.totalorder %s12_s11, 5   ;;  %s960_s10 = smov %s962_s12 }
 0x129   :  { %11 = sbr.rel (!%p9_p7) target bundleno = 2 (0x2), region = 69 }

</bundles_post_ra>
